<compile_context>
chip_gen: v6e
topology: v6e:2x2x1
jax: 0.10.0
libtpu: 0.0.40
codegen_flags: <defaults>
</compile_context>

<pallas_src>
import functools
import math

import jax
import jax.numpy as jnp
from jax.experimental import pallas as pl
from jax.experimental.pallas import tpu as pltpu

_GRANULE = 8 * 128            # one fully dense (8,128) f32 vreg worth of N elems
_MAX_TILE_N = 256 * 1024      # N elements per grid step (≈18 MiB double-buffered)


def _ceil_to(x, m):
    return -(-x // m) * m


def poixd_tensor_mult_kernel(x_ref, o_ref, *, k):
    """x_ref: (K, 3, 8, TL) stacked columns; o_ref: (3, 8, TL) group products."""
    s = jnp.sin(math.pi * x_ref[...])          # dense sublane/lane VPU work
    p = s[0]                                   # (3, 8, TL): whole-slab select
    for j in range(1, k):                      # unrolled dense multiplies
        p = p * s[j]
    o_ref[...] = p.astype(o_ref.dtype)         # single full-tile unmasked store


def poixd_tensor_mult(quad_x, param_a, quad_concat, *, max_tile_n=_MAX_TILE_N):
    """Pallas forward of PoiXd_tensor_mult.

    quad_x:      sequence of (N, C) arrays; only column 0 of each is used.
    param_a:     accepted for interface fidelity; the PyTorch forward never
                 reads it, so neither does this implementation.
    quad_concat: sequence of >= 3 index groups into quad_x.
    Returns (l1, l2, l3), each of shape (N,).
    """
    del param_a  # unused by the original forward as well

    groups = [list(int(k) for k in idx) for idx in quad_concat[:3]]
    assert len(groups) == 3, "PoiXd_tensor_mult.forward uses exactly 3 groups"

    n = quad_x[groups[0][0]].shape[0]
    dtype = quad_x[groups[0][0]].dtype
    itemsize = jnp.dtype(dtype).itemsize
    k_max = max(len(g) for g in groups)

    # Pack as (K, 3, N): slot (j, g) holds the j-th member of group g; short
    # groups are filled with 0.5 (sin(pi*0.5) == 1, multiplicative identity).
    fill = None
    slabs = []
    for j in range(k_max):
        row_g = []
        for g in range(3):
            idx = groups[g]
            if j < len(idx):
                col = quad_x[idx[j]][:, 0]
                assert col.shape[0] == n, "groups must share a quadrature length"
                row_g.append(col)
            else:
                if fill is None:
                    fill = jnp.full((n,), 0.5, dtype=dtype)
                row_g.append(fill)
        slabs.append(jnp.stack(row_g, axis=0))            # (3, N)
    x = jnp.stack(slabs, axis=0)                          # (K, 3, N)

    # Tile sizing: pad N to a multiple of one dense vreg (8*128 elems), then
    # pick the number of grid steps so tiles fit the VMEM budget and v7x's two
    # TensorCores both get work when N is large enough.
    n_pad = _ceil_to(max(n, 1), _GRANULE)
    num_tiles = max(1, -(-n_pad // max_tile_n))
    if num_tiles == 1 and n_pad >= 2 * _GRANULE:
        num_tiles = 2
    tile_n = _ceil_to(-(-(n_pad // _GRANULE) // num_tiles), 1) * _GRANULE
    n_pad = tile_n * num_tiles
    if n_pad != n:
        x = jnp.pad(x, ((0, 0), (0, 0), (0, n_pad - n)))  # sin(0)=0, sliced off

    lanes = n_pad // 8
    tile_l = tile_n // 8
    # Sublane-dense layout: every (8, tile_l) slab is a fully packed vreg tile.
    x = x.reshape(k_max, 3, 8, lanes)

    in_tile_bytes = k_max * 3 * tile_n * itemsize
    out_tile_bytes = 3 * tile_n * itemsize
    vmem_limit = int(2 * (in_tile_bytes + out_tile_bytes) * 1.5) + (1 << 20)
    vmem_limit = max(4 << 20, min(vmem_limit, 64 << 20))

    out = pl.pallas_call(
        functools.partial(poixd_tensor_mult_kernel, k=k_max),
        out_shape=jax.ShapeDtypeStruct((3, 8, lanes), dtype),
        grid=(num_tiles,),
        in_specs=[pl.BlockSpec((k_max, 3, 8, tile_l), lambda i: (0, 0, 0, i))],
        out_specs=pl.BlockSpec((3, 8, tile_l), lambda i: (0, 0, i)),
        compiler_params=pltpu.CompilerParams(
            dimension_semantics=("parallel",),
            vmem_limit_bytes=vmem_limit,
            allow_input_fusion=[True],
        ),
        cost_estimate=pl.CostEstimate(
            flops=(k_max * 3 * 16 + 3 * (k_max - 1)) * n_pad,
            transcendentals=k_max * 3 * n_pad,
            bytes_accessed=(k_max * 3 + 3) * n_pad * itemsize,
        ),
    )(x)

    out = out.reshape(3, n_pad)          # free row-major flatten back to N order
    return out[0, :n], out[1, :n], out[2, :n]


def poixd_tensor_mult_ref(quad_x, quad_concat):
    """Pure-JAX reference mirroring the PyTorch forward."""
    outs = []
    for idx in quad_concat[:3]:
        l = jnp.sin(jnp.pi * quad_x[idx[0]][:, 0])
        for k in idx[1:]:
            l = l * jnp.sin(jnp.pi * quad_x[k][:, 0])
        outs.append(l)
    return tuple(outs)


if __name__ == "__main__":
    key = jax.random.PRNGKey(0)
    # Small config consistent with the module: 3 groups of 2 quadrature arrays
    # each, 8 quadrature points per array, 2 columns (only column 0 is used).
    n_pts = 8
    quad_concat = [[0, 1], [2, 3], [4, 5]]
    keys = jax.random.split(key, 7)
    quad_x = [jax.random.uniform(keys[k], (n_pts, 2), dtype=jnp.float32)
              for k in range(6)]
    param_a = jax.random.uniform(keys[6], (), dtype=jnp.float32)  # unused by forward

    l1, l2, l3 = poixd_tensor_mult(quad_x, param_a, quad_concat)
    (l1, l2, l3) = jax.block_until_ready((l1, l2, l3))

    r1, r2, r3 = poixd_tensor_mult_ref(quad_x, quad_concat)
    assert l1.shape == (n_pts,) and l2.shape == (n_pts,) and l3.shape == (n_pts,)
    assert jnp.allclose(l1, r1, rtol=1e-5, atol=1e-6), (l1, r1)
    assert jnp.allclose(l2, r2, rtol=1e-5, atol=1e-6), (l2, r2)
    assert jnp.allclose(l3, r3, rtol=1e-5, atol=1e-6), (l3, r3)

    print("KERNEL_OK")
</pallas_src>

<mosaic_0001>
module attributes {stable_mosaic.version = 11 : i64} {
  func.func @poixd_tensor_mult_kernel(%arg0: i32, %arg1: memref<2x3x8x128xf32, #tpu.memory_space<vmem>>, %arg2: memref<3x8x128xf32, #tpu.memory_space<vmem>>) attributes {dimension_semantics = [#tpu.dimension_semantics<parallel>], iteration_bounds = array<i64: 1>, scalar_prefetch = 0 : i64, scratch_operands = 0 : i64, tpu.core_type = #tpu.core_type<tc>, window_params = [{transform_indices = @transform_0, window_bounds = array<i64: 2, 3, 8, 128>}, {transform_indices = @transform_1, window_bounds = array<i64: 3, 8, 128>}]} {
    %c0 = arith.constant 0 : index
    %c0_0 = arith.constant 0 : index
    %c0_1 = arith.constant 0 : index
    %c0_2 = arith.constant 0 : index
    %0 = vector.load %arg1[%c0, %c0_0, %c0_1, %c0_2] : memref<2x3x8x128xf32, #tpu.memory_space<vmem>>, vector<2x3x8x128xf32>
    %cst = arith.constant 3.14159274 : f32
    %1 = vector.broadcast %cst : f32 to vector<2x3x8x128xf32>
    %2 = arith.mulf %1, %0 : vector<2x3x8x128xf32>
    %3 = math.sin %2 : vector<2x3x8x128xf32>
    %4 = vector.extract_strided_slice %3 {offsets = [0, 0, 0, 0], sizes = [1, 3, 8, 128], strides = [1, 1, 1, 1]} : vector<2x3x8x128xf32> to vector<1x3x8x128xf32>
    %5 = vector.shape_cast %4 : vector<1x3x8x128xf32> to vector<3x8x128xf32>
    %6 = vector.extract_strided_slice %3 {offsets = [1, 0, 0, 0], sizes = [1, 3, 8, 128], strides = [1, 1, 1, 1]} : vector<2x3x8x128xf32> to vector<1x3x8x128xf32>
    %7 = vector.shape_cast %6 : vector<1x3x8x128xf32> to vector<3x8x128xf32>
    %8 = arith.mulf %5, %7 : vector<3x8x128xf32>
    %c0_3 = arith.constant 0 : index
    %c0_4 = arith.constant 0 : index
    %c0_5 = arith.constant 0 : index
    %9 = vector.load %arg2[%c0_3, %c0_4, %c0_5] : memref<3x8x128xf32, #tpu.memory_space<vmem>>, vector<3x8x128xf32>
    tpu.vector_store %arg2[%c0_3, %c0_4, %c0_5], %8 {strides = array<i32>} : memref<3x8x128xf32, #tpu.memory_space<vmem>>, vector<3x8x128xf32>,
    return
  }
  func.func @transform_0(%arg0: i32) -> (i32, i32, i32, i32) {
    %c0_i32 = arith.constant 0 : i32
    %c0_i32_0 = arith.constant 0 : i32
    %c0_i32_1 = arith.constant 0 : i32
    %c0_i32_2 = arith.constant 0 : i32
    return %c0_i32, %c0_i32_0, %c0_i32_1, %arg0 : i32, i32, i32, i32
  }
  func.func @transform_1(%arg0: i32) -> (i32, i32, i32) {
    %c0_i32 = arith.constant 0 : i32
    %c0_i32_0 = arith.constant 0 : i32
    %c0_i32_1 = arith.constant 0 : i32
    return %c0_i32, %c0_i32_0, %arg0 : i32, i32, i32
  }
}

</mosaic_0001>

<bundles_post_ra>
// kernel: tpu_custom_call.1
= control target key start
LH: loop header
LB: loop body
LE: loop exit
PB: predicated region body
PF: predicated region fallthrough
CT: control target
= control target key end

     0   :  { %6 = vsyncpa [#allocation3], 0  ;;  %s1284_s0 = inlined_call_operand.hbm [shape: f32[2,3,8,128], index: 0, kind: input, shape index: {}]   ;;  %s1285_s1 = inlined_call_operand.hbm [shape: f32[3,8,128], index: 1, kind: output, shape index: {}]  }
   0x1   :  { %7 = vsyncpa [#allocation4], 0  ;;  %s808_s6 = smov [#allocation2]  }
   0x2   :  { %s13_s7 = sshll.u32 %s808_s6, 4  ;;  %s14_s7 = int_to_ptr.vmem [resolvable:$true] %s13_s7 }
   0x3   :  { %s772_s8 = scalar_lea.vmem %s14_s7, 768  ;;  %p777_p1 = scmp.lt.s32.totalorder %s14_s7, %s14_s7 }
   0x4   :  { %p773_p0 = scmp.ne.s32.totalorder %s14_s7, %s772_s8  ;;  %p778_p2 = scmp.lt.s32.totalorder %s772_s8, %s772_s8 }
   0x6   :  { %p779_p3 = por %p778_p2, %p777_p1 }
   0x8   :  { %p780_p4 = pnand %p779_p3, %p773_p0 }
   0xa   :  { %783 = shalt.err (!%p780_p4)
}
   0xb   :  { %s809_s9 = smov 128   ;;  %s810_s10 = smov 8  }
   0xc   :  { %19 = dma.hbm_to_vmem [thread:$0]  %s1284_s0, 768, %s14_s7, [#allocation3], %s809_s9, %s809_s9, %s810_s10  }
   0xd   :  { %804 = dma.done.wait [#allocation3], 768  }
   0xe   :  { %805 = vsyncadd [#allocation3], 4294966528  ;;  %v23_v0 = vld [vmem:[#allocation2] sm:$0xff]  ;;  %v24_v1 = vld [vmem:[#allocation2 + $0x8] sm:$0xff]  ;;  %v811_v34 = vmov 683565275  }
   0xf   :  { %v25_v2 = vld [vmem:[#allocation2 + $0x10] sm:$0xff]  ;;  %v834_v3 = vmul.f32 3.1415927, %v23_v0  ;;  %v836_v4 = vmul.f32 3.1415927, %v24_v1  ;;  %v26_v19 = vld [vmem:[#allocation2 + $0x18] sm:$0xff] }
  0x10   :  { %v838_v5 = vmul.f32 3.1415927, %v25_v2  ;;  %v849_v25 = vmul.f32 3.1415927, %v26_v19  ;;  %v812_v36 = vmov 2475754826  }
  0x11   :  { %v35_v6 = vand.u32 2147483647, %v834_v3  ;;  %v38_v7 = vand.u32 2139095040, %v834_v3  ;;  %v139_v8 = vand.u32 2147483647, %v836_v4  ;;  %v142_v9 = vand.u32 2139095040, %v836_v4 }
  0x12   :  { %v246_v14 = vand.u32 2139095040, %v838_v5  ;;  %v813_v38 = vmov 2131351028   ;;  %v814_v40 = vmov 2102212464   ;;  %s817_s0 = smov [#allocation5]  }
  0x13   :  { %v39_v10 = vshrl.u32 %v38_v7, 23  ;;  %v42_v11 = vand.u32 8388607, %v35_v6  ;;  %v143_v12 = vshrl.u32 %v142_v9, 23  ;;  %v146_v13 = vand.u32 8388607, %v139_v8 }
  0x14   :  { %v247_v17 = vshrl.u32 %v246_v14, 23  ;;  %v815_v42 = vmov 920167782   ;;  %v816_v50 = vmov 1326507024   ;;  %s670_s13 = sshll.u32 %s817_s0, 4  ;;  %s671_s13 = int_to_ptr.vmem [resolvable:$true] %s670_s13 }
  0x15   :  { %v682_v15 = vadd.s32 4294967169, %v39_v10  ;;  %v686_v16 = vadd.s32 4294967169, %v143_v12  ;;  %v43_v20 = vor.u32 8388608, %v42_v11  ;;  %v147_v21 = vor.u32 8388608, %v146_v13  ;;  %s784_s14 = scalar_lea.vmem %s671_s13, 384  ;;  %p789_p6 = scmp.lt.s32.totalorder %s671_s13, %s671_s13 }
  0x16   :  { %v690_v23 = vadd.s32 4294967169, %v247_v17  ;;  %p785_p5 = scmp.ne.s32.totalorder %s671_s13, %s784_s14  ;;  %p790_p7 = scmp.lt.s32.totalorder %s784_s14, %s784_s14 }
  0x17   :  { %v45_v18 = vadd.s32 1, %v682_v15  ;;  %v149_v22 = vadd.s32 1, %v686_v16  ;;  %v851_v29 = vshll.u32 %v43_v20, 8  ;;  %v853_v31 = vshll.u32 %v147_v21, 8 }
  0x18   :  { %v855_v32 = vadd.s32 1, %v690_v23  ;;  %p791_p8 = por %p790_p7, %p789_p6 }
  0x19   :  { %vm46_vm0 = vcmp.gt.s32.totalorder %v45_v18, 0  ;;  %vm150_vm1 = vcmp.gt.s32.totalorder %v149_v22, 0 }
  0x1a   :  { %v47_v24 = vsel %vm46_vm0, %v45_v18, 0  ;;  %v151_v28 = vsel %vm150_vm1, %v149_v22, 0  ;;  %vm254_vm6 = vcmp.gt.s32.totalorder %v855_v32, 0  ;;  %p792_p9 = pnand %p791_p8, %p785_p5 }
  0x1b   :  { %v48_v26 = vshrl.u32 %v47_v24, 5  ;;  %v49_v27 = vand.u32 31, %v47_v24  ;;  %v153_v30 = vand.u32 31, %v151_v28  ;;  %v862_v44 = vshrl.u32 %v151_v28, 5 }
  0x1d   :  { %v50_v33 = vsub.s32 32, %v49_v27  ;;  %v52_v35 = vshll.u32 %v811_v34, %v49_v27  ;;  %v55_v37 = vshll.u32 %v812_v36, %v49_v27  ;;  %v58_v39 = vshll.u32 %v813_v38, %v49_v27 }
  0x1e   :  { %v61_v41 = vshll.u32 %v814_v40, %v49_v27  ;;  %v64_v43 = vshll.u32 %v815_v42, %v49_v27  ;;  %vm67_vm2 = vcmp.lt.s32.totalorder %v48_v26, 1  ;;  %vm68_vm3 = vcmp.lt.s32.totalorder %v48_v26, 2 }
  0x1f   :  { %v51_v45 = vshrl.u32 %v811_v34, %v50_v33  ;;  %v53_v46 = vshrl.u32 %v812_v36, %v50_v33  ;;  %v56_v47 = vshrl.u32 %v813_v38, %v50_v33  ;;  %v59_v48 = vshrl.u32 %v814_v40, %v50_v33 }
  0x20   :  { %v62_v49 = vshrl.u32 %v815_v42, %v50_v33  ;;  %v65_v51 = vshrl.u32 %v816_v50, %v50_v33  ;;  %vm70_vm4 = vcmp.lt.s32.totalorder %v48_v26, 4  ;;  %v154_v55 = vsub.s32 32, %v153_v30 }
  0x21   :  { %v54_v52 = vor.u32 %v53_v46, %v52_v35  ;;  %v57_v53 = vor.u32 %v56_v47, %v55_v37  ;;  %v60_v54 = vor.u32 %v59_v48, %v58_v39  ;;  %vm69_vm5 = vcmp.lt.s32.totalorder %v48_v26, 3 }
  0x22   :  { %v63_v56 = vor.u32 %v62_v49, %v61_v41  ;;  %v66_v57 = vor.u32 %v65_v51, %v64_v43  ;;  %v156_v58 = vshll.u32 %v811_v34, %v153_v30  ;;  %v159_v2 = vshll.u32 %v812_v36, %v153_v30 }
  0x23   :  { %v71_v59 = vsel %vm67_vm2, %v51_v45, %v54_v52  ;;  %v72_v60 = vsel %vm70_vm4, %v60_v54, 2102212464  ;;  %v75_v61 = vsel %vm67_vm2, %v54_v52, %v57_v53  ;;  %v79_v62 = vsel %vm67_vm2, %v57_v53, %v60_v54 }
  0x24   :  { %v73_v63 = vsel %vm69_vm5, %v57_v53, %v72_v60  ;;  %v76_v0 = vsel %vm70_vm4, %v63_v56, 920167782  ;;  %v80_v1 = vsel %vm70_vm4, %v66_v57, 1326507024  ;;  %v155_v10 = vshrl.u32 %v811_v34, %v154_v55 }
  0x25   :  { %v77_v7 = vsel %vm69_vm5, %v60_v54, %v76_v0  ;;  %v81_v9 = vsel %vm69_vm5, %v63_v56, %v80_v1  ;;  %v157_v11 = vshrl.u32 %v812_v36, %v154_v55  ;;  %v74_v12 = vsel %vm68_vm3, %v71_v59, %v73_v63 }
  0x26   :  { %v78_v13 = vsel %vm68_vm3, %v75_v61, %v77_v7  ;;  %v82_v14 = vsel %vm68_vm3, %v79_v62, %v81_v9  ;;  %v160_v15 = vshrl.u32 %v813_v38, %v154_v55  ;;  %v162_v22 = vshll.u32 %v813_v38, %v153_v30 }
  0x27   :  { %v883_v16 = vmul.u32.u64.low %v851_v29, %v82_v14  ;;  %v884_v17 = vmul.u32.u64.high %v851_v29, %v82_v14, %v883_v16  ;;  %v887_v18 = vmul.u32.u64.low %v851_v29, %v78_v13  ;;  %v888_v19 = vmul.u32.u64.high %v851_v29, %v78_v13, %v887_v18 }
  0x28   :  { %v158_v20 = vor.u32 %v157_v11, %v156_v58  ;;  %v161_v21 = vor.u32 %v160_v15, %v159_v2  ;;  %v163_v23 = vshrl.u32 %v814_v40, %v154_v55  ;;  %v165_v24 = vshll.u32 %v814_v40, %v153_v30 }
  0x29   :  { %v166_v26 = vshrl.u32 %v815_v42, %v154_v55  ;;  %v168_v27 = vshll.u32 %v815_v42, %v153_v30  ;;  %v169_v28 = vshrl.u32 %v816_v50, %v154_v55  ;;  %v90_v33 = vmul.u32 %v851_v29, %v74_v12 }
  0x2a   :  { %v164_v35 = vor.u32 %v163_v23, %v162_v22  ;;  %vm171_vm7 = vcmp.lt.s32.totalorder %v862_v44, 1  ;;  %vm172_vm8 = vcmp.lt.s32.totalorder %v862_v44, 2  ;;  %vm92_vm9 = vc.u32 %v884_v17, %v887_v18 }
  0x2b   :  { %v93_v37 = vadd.s32 1, %v888_v19  ;;  %v167_v39 = vor.u32 %v166_v26, %v165_v24  ;;  %vm173_vm10 = vcmp.lt.s32.totalorder %v862_v44, 3  ;;  %v170_v41 = vor.u32 %v169_v28, %v168_v27 }
  0x2c   :  { %vm174_vm11 = vcmp.lt.s32.totalorder %v862_v44, 4  ;;  %v175_v30 = vsel %vm171_vm7, %v155_v10, %v158_v20  ;;  %v179_v43 = vsel %vm171_vm7, %v158_v20, %v161_v21  ;;  %v183_v47 = vsel %vm171_vm7, %v161_v21, %v164_v35 }
  0x2d   :  { %v94_v29 = vsel %vm92_vm9, %v93_v37, %v888_v19  ;;  %v176_v45 = vsel %vm174_vm11, %v164_v35, 2102212464  ;;  %v180_v46 = vsel %vm174_vm11, %v167_v39, 920167782  ;;  %v184_v52 = vsel %vm174_vm11, %v170_v41, 1326507024 }
  0x2e   :  { %v95_v48 = vadd.s32 %v94_v29, %v90_v33  ;;  %v177_v49 = vsel %vm173_vm10, %v161_v21, %v176_v45  ;;  %v181_v51 = vsel %vm173_vm10, %v164_v35, %v180_v46  ;;  %v185_v55 = vsel %vm173_vm10, %v167_v39, %v184_v52 }
  0x2f   :  { %v178_v53 = vsel %vm172_vm8, %v175_v30, %v177_v49  ;;  %v182_v54 = vsel %vm172_vm8, %v179_v43, %v181_v51  ;;  %v255_v56 = vsel %vm254_vm6, %v855_v32, 0  ;;  %v186_v58 = vsel %vm172_vm8, %v183_v47, %v185_v55 }
  0x30   :  { %v96_v57 = vadd.s32 536870912, %v95_v48  ;;  %v916_v59 = vmul.u32.u64.low %v853_v31, %v182_v54  ;;  %v917_v60 = vmul.u32.u64.high %v853_v31, %v182_v54, %v916_v59  ;;  %v257_v0 = vand.u32 31, %v255_v56 }
  0x31   :  { %v921_v61 = vmul.u32.u64.low %v853_v31, %v186_v58  ;;  %v922_v62 = vmul.u32.u64.high %v853_v31, %v186_v58, %v921_v61  ;;  %v194_v1 = vmul.u32 %v853_v31, %v178_v53  ;;  %v350_v32 = vand.u32 2139095040, %v849_v25 }
  0x32   :  { %v924_v63 = vshrl.u32 %v96_v57, 30  ;;  %v197_v44 = vadd.s32 1, %v917_v60  ;;  %v258_v7 = vsub.s32 32, %v257_v0  ;;  %v243_v11 = vand.u32 2147483647, %v838_v5 }
  0x33   :  { %vm196_vm12 = vc.u32 %v922_v62, %v916_v59  ;;  %v256_v13 = vshrl.u32 %v255_v56, 5  ;;  %v260_v31 = vshll.u32 %v811_v34, %v257_v0  ;;  %v351_v14 = vshrl.u32 %v350_v32, 23 }
  0x34   :  { %v98_v2 = vshll.u32 %v924_v63, 30  ;;  %v198_v10 = vsel %vm196_vm12, %v197_v44, %v917_v60  ;;  %v261_v16 = vshrl.u32 %v812_v36, %v258_v7  ;;  %v263_v19 = vshll.u32 %v812_v36, %v257_v0 }
  0x35   :  { %v199_v12 = vadd.s32 %v198_v10, %v194_v1  ;;  %v264_v20 = vshrl.u32 %v813_v38, %v258_v7  ;;  %v266_v22 = vshll.u32 %v813_v38, %v257_v0  ;;  %v267_v23 = vshrl.u32 %v814_v40, %v258_v7 }
  0x36   :  { %v932_v9 = vsub.s32 %v95_v48, %v98_v2  ;;  %v269_v24 = vshll.u32 %v814_v40, %v257_v0  ;;  %v250_v26 = vand.u32 8388607, %v243_v11  ;;  %v270_v27 = vshrl.u32 %v815_v42, %v258_v7 }
  0x37   :  { %v200_v21 = vadd.s32 536870912, %v199_v12  ;;  %v272_v33 = vshll.u32 %v815_v42, %v257_v0  ;;  %v273_v35 = vshrl.u32 %v816_v50, %v258_v7  ;;  %v262_v37 = vor.u32 %v261_v16, %v260_v31 }
  0x38   :  { %v101_v15 = vsub.s32 0, %v932_v9  ;;  %vm278_vm13 = vcmp.lt.s32.totalorder %v256_v13, 4  ;;  %v694_v39 = vadd.s32 4294967169, %v351_v14  ;;  %v265_v30 = vor.u32 %v264_v20, %v263_v19 }
  0x39   :  { %v950_v41 = vshrl.u32 %v200_v21, 30  ;;  %v268_v43 = vor.u32 %v267_v23, %v266_v22  ;;  %v271_v29 = vor.u32 %v270_v27, %v269_v24  ;;  %v251_v45 = vor.u32 8388608, %v250_v26 }
  0x3a   :  { %v683_v28 = vmin.u32 %v101_v15, %v932_v9  ;;  %v274_v46 = vor.u32 %v273_v35, %v272_v33  ;;  %vm275_vm14 = vcmp.lt.s32.totalorder %v256_v13, 1  ;;  %vm277_vm15 = vcmp.lt.s32.totalorder %v256_v13, 3 }
  0x3b   :  { %v284_v48 = vsel %vm278_vm13, %v271_v29, 920167782  ;;  %vm276_vm0 = vcmp.lt.s32.totalorder %v256_v13, 2  ;;  %v357_v49 = vadd.s32 1, %v694_v39  ;;  %v202_v51 = vshll.u32 %v950_v41, 30 }
  0x3c   :  { %v103_v47 = vclz %v683_v28  ;;  %v283_v52 = vsel %vm275_vm14, %v262_v37, %v265_v30  ;;  %v285_v53 = vsel %vm277_vm15, %v268_v43, %v284_v48  ;;  %v287_v54 = vsel %vm275_vm14, %v265_v30, %v268_v43 }
  0x3d   :  { %v288_v55 = vsel %vm278_vm13, %v274_v46, 1326507024  ;;  %v291_v56 = vshll.u32 %v251_v45, 8  ;;  %v286_v60 = vsel %vm276_vm0, %v283_v52, %v285_v53  ;;  %vm358_vm1 = vcmp.gt.s32.totalorder %v357_v49, 0 }
  0x3e   :  { %v684_v57 = vadd.s32 4294967294, %v103_v47  ;;  %v289_v58 = vsel %vm277_vm15, %v271_v29, %v288_v55  ;;  %v961_v0 = vsub.s32 %v199_v12, %v202_v51  ;;  %v259_v1 = vshrl.u32 %v811_v34, %v258_v7 }
  0x3f   :  { %v290_v61 = vsel %vm276_vm0, %v287_v54, %v289_v58  ;;  %v280_v32 = vsel %vm278_vm13, %v268_v43, 2102212464  ;;  %v968_v10 = vmul.u32.u64.low %v291_v56, %v286_v60  ;;  %v969_v31 = vmul.u32.u64.high %v291_v56, %v286_v60, %v968_v10 }
  0x40   :  { %v965_v2 = vmul.u32.u64.low %v291_v56, %v290_v61  ;;  %v966_v44 = vmul.u32.u64.high %v291_v56, %v290_v61, %v965_v2  ;;  %vm685_vm2 = vcmp.lt.s32.totalorder %v684_v57, 0  ;;  %v359_v14 = vsel %vm358_vm1, %v357_v49, 0 }
  0x41   :  { %v361_v15 = vand.u32 31, %v359_v14  ;;  %v205_v16 = vsub.s32 0, %v961_v0  ;;  %v106_v19 = vsel %vm685_vm2, 0, %v684_v57  ;;  %v279_v12 = vsel %vm275_vm14, %v259_v1, %v262_v37 }
  0x42   :  { %v281_v20 = vsel %vm277_vm15, %v265_v30, %v280_v32  ;;  %v347_v7 = vand.u32 2147483647, %v849_v25  ;;  %v111_v22 = vsub.s32 4294967266, %v106_v19  ;;  %v91_v26 = vadd.s32 %v887_v18, %v884_v17  ;;  %v27_v32 = vld [vmem:[#allocation2 + $0x20] sm:$0xff] }
  0x43   :  { %v362_v21 = vsub.s32 32, %v361_v15  ;;  %v687_v23 = vmin.u32 %v205_v16, %v961_v0  ;;  %v282_v24 = vsel %vm276_vm0, %v279_v12, %v281_v20  ;;  %vm300_vm3 = vc.u32 %v966_v44, %v968_v10 }
  0x44   :  { %v301_v27 = vadd.s32 1, %v969_v31  ;;  %v354_v28 = vand.u32 8388607, %v347_v7  ;;  %v364_v33 = vshll.u32 %v811_v34, %v361_v15  ;;  %v367_v37 = vshll.u32 %v812_v36, %v361_v15 }
  0x45   :  { %v365_v35 = vshrl.u32 %v812_v36, %v362_v21  ;;  %v368_v13 = vshrl.u32 %v813_v38, %v362_v21  ;;  %v107_v39 = vsub.s32 32, %v106_v19  ;;  %v298_v30 = vmul.u32 %v291_v56, %v282_v24 }
  0x46   :  { %v360_v43 = vshrl.u32 %v359_v14, 5  ;;  %v373_v17 = vshll.u32 %v814_v40, %v361_v15  ;;  %v112_v18 = vadd.s32 127, %v111_v22  ;;  %v207_v29 = vclz %v687_v23 }
  0x47   :  { %v370_v45 = vshll.u32 %v813_v38, %v361_v15  ;;  %v371_v46 = vshrl.u32 %v814_v40, %v362_v21  ;;  %v302_v47 = vsel %vm300_vm3, %v301_v27, %v969_v31  ;;  %v355_v48 = vor.u32 8388608, %v354_v28 }
  0x48   :  { %v374_v49 = vshrl.u32 %v815_v42, %v362_v21  ;;  %v366_v51 = vor.u32 %v365_v35, %v364_v33  ;;  %v369_v52 = vor.u32 %v368_v13, %v367_v37  ;;  %v376_v53 = vshll.u32 %v815_v42, %v361_v15 }
  0x49   :  { %v377_v54 = vshrl.u32 %v816_v50, %v362_v21  ;;  %v108_v55 = vshll.u32 %v932_v9, %v106_v19  ;;  %v109_v56 = vshrl.u32 %v91_v26, %v107_v39  ;;  %vm379_vm4 = vcmp.lt.s32.totalorder %v360_v43, 1 }
  0x4a   :  { %v375_v57 = vor.u32 %v374_v49, %v373_v17  ;;  %v113_v58 = vshll.u32 %v112_v18, 23  ;;  %v688_v60 = vadd.s32 4294967294, %v207_v29  ;;  %v303_v61 = vadd.s32 %v302_v47, %v298_v30 }
  0x4b   :  { %v372_v1 = vor.u32 %v371_v46, %v370_v45  ;;  %v363_v2 = vshrl.u32 %v811_v34, %v362_v21  ;;  %vm381_vm5 = vcmp.lt.s32.totalorder %v360_v43, 3  ;;  %vm382_vm6 = vcmp.lt.s32.totalorder %v360_v43, 4 }
  0x4c   :  { %v395_v31 = vshll.u32 %v355_v48, 8  ;;  %v378_v14 = vor.u32 %v377_v54, %v376_v53  ;;  %vm380_vm7 = vcmp.lt.s32.totalorder %v360_v43, 2  ;;  %v387_v16 = vsel %vm379_vm4, %v366_v51, %v369_v52 }
  0x4d   :  { %v384_v15 = vsel %vm382_vm6, %v372_v1, 2102212464  ;;  %v110_v9 = vor.u32 %v109_v56, %v108_v55  ;;  %v388_v19 = vsel %vm382_vm6, %v375_v57, 920167782  ;;  %v1001_v12 = vmul.f32 3.1415927, %v27_v32 }
  0x4e   :  { %v114_v20 = vor.u32 4788187, %v113_v58  ;;  %v304_v22 = vadd.s32 536870912, %v303_v61  ;;  %v389_v23 = vsel %vm381_vm5, %v372_v1, %v388_v19  ;;  %vm689_vm8 = vcmp.lt.s32.totalorder %v688_v60, 0 }
  0x4f   :  { %v383_v21 = vsel %vm379_vm4, %v363_v2, %v366_v51  ;;  %v385_v24 = vsel %vm381_vm5, %v369_v52, %v384_v15  ;;  %v390_v26 = vsel %vm380_vm7, %v387_v16, %v389_v23  ;;  %v391_v27 = vsel %vm379_vm4, %v369_v52, %v372_v1 }
  0x50   :  { %v392_v28 = vsel %vm382_vm6, %v378_v14, 1326507024  ;;  %v1009_v33 = vmul.u32.u64.low %v395_v31, %v390_v26  ;;  %v1010_v35 = vmul.u32.u64.high %v395_v31, %v390_v26, %v1009_v33  ;;  %v117_v37 = vcvt.s32.f32 %v110_v9 }
  0x51   :  { %v115_v13 = vand.u32 2147483647, %v114_v20  ;;  %v210_v39 = vsel %vm689_vm8, 0, %v688_v60  ;;  %v1013_v30 = vshrl.u32 %v304_v22, 30  ;;  %v393_v17 = vsel %vm381_vm5, %v375_v57, %v392_v28  ;;  %v28_v57 = vld [vmem:[#allocation2 + $0x28] sm:$0xff] }
  0x52   :  { %v386_v18 = vsel %vm380_vm7, %v383_v21, %v385_v24  ;;  %v394_v29 = vsel %vm380_vm7, %v391_v27, %v393_v17  ;;  %v454_v45 = vand.u32 2139095040, %v1001_v12  ;;  %v215_v48 = vsub.s32 4294967266, %v210_v39 }
  0x53   :  { %v1019_v46 = vmul.u32.u64.low %v395_v31, %v394_v29  ;;  %v1020_v47 = vmul.u32.u64.high %v395_v31, %v394_v29, %v1019_v46  ;;  %v405_v49 = vadd.s32 1, %v1010_v35  ;;  %v118_v52 = vmul.f32 %v117_v37, %v115_v13 }
  0x54   :  { %v455_v51 = vshrl.u32 %v454_v45, 23  ;;  %v306_v53 = vshll.u32 %v1013_v30, 30  ;;  %v402_v54 = vmul.u32 %v395_v31, %v386_v18  ;;  %v195_v55 = vadd.s32 %v916_v59, %v922_v62 }
  0x55   :  { %v211_v56 = vsub.s32 32, %v210_v39  ;;  %vm404_vm9 = vc.u32 %v1020_v47, %v1009_v33  ;;  %v121_v58 = vsub.s32 4, %v924_v63  ;;  %v216_v60 = vadd.s32 127, %v215_v48 }
  0x56   :  { %v698_v43 = vadd.s32 4294967169, %v455_v51  ;;  %v406_v1 = vsel %vm404_vm9, %v405_v49, %v1010_v35  ;;  %v119_v32 = vxor.u32 2147483648, %v118_v52  ;;  %v1030_v2 = vsub.s32 %v303_v61, %v306_v53 }
  0x57   :  { %v407_v14 = vadd.s32 %v406_v1, %v402_v54  ;;  %vm37_vm10 = vcmp.lt.s32.totalorder %v834_v3, 0  ;;  %v212_v59 = vshll.u32 %v961_v0, %v210_v39  ;;  %v213_v62 = vshrl.u32 %v195_v55, %v211_v56 }
  0x58   :  { %v461_v15 = vadd.s32 1, %v698_v43  ;;  %v1034_v31 = vmul.f32 3.1415927, %v28_v57  ;;  %v451_v9 = vand.u32 2147483647, %v1001_v12  ;;  %v1044_v61 = vsel %vm37_vm10, %v121_v58, %v924_v63 }
  0x59   :  { %v408_v16 = vadd.s32 536870912, %v407_v14  ;;  %vm1039_vm12 = vcmp.le.f32.partialorder %v35_v6, 0.7853982  ;;  %v217_v20 = vshll.u32 %v216_v60, 23  ;;  %v120_v23 = vsel %vm37_vm10, %v119_v32, %v118_v52 }
  0x5a   :  { %vm462_vm11 = vcmp.gt.s32.totalorder %v461_v15, 0  ;;  %v309_v0 = vsub.s32 0, %v1030_v2  ;;  %v1049_v26 = vor.u32 %v213_v62, %v212_v59  ;;  %v458_v6 = vand.u32 8388607, %v451_v9 }
  0x5b   :  { %v463_v22 = vsel %vm462_vm11, %v461_v15, 0  ;;  %v1047_v21 = vshrl.u32 %v408_v16, 30  ;;  %v123_v63 = vsel %vm1039_vm12, %v834_v3, %v120_v23  ;;  %v124_v35 = vsel %vm1039_vm12, 0, %v1044_v61 }
  0x5c   :  { %v465_v24 = vand.u32 31, %v463_v22  ;;  %v1060_v37 = vor.u32 4788187, %v217_v20  ;;  %v1063_v13 = vmin.u32 %v309_v0, %v1030_v2  ;;  %v558_v17 = vand.u32 2139095040, %v1034_v31 }
  0x5d   :  { %v410_v27 = vshll.u32 %v1047_v21, 30  ;;  %v221_v18 = vcvt.s32.f32 %v1049_v26  ;;  %740 = vcosq.f32 %v123_v63  ;;  %v459_v49 = vor.u32 8388608, %v458_v6 }
  0x5e   :  { %v466_v28 = vsub.s32 32, %v465_v24  ;;  %v468_v29 = vshll.u32 %v811_v34, %v465_v24  ;;  %v471_v46 = vshll.u32 %v812_v36, %v465_v24  ;;  %v464_v52 = vshrl.u32 %v463_v22, 5 }
  0x5f   :  { %v1065_v39 = vsub.s32 %v407_v14, %v410_v27  ;;  %v474_v53 = vshll.u32 %v813_v38, %v465_v24  ;;  %v477_v55 = vshll.u32 %v814_v40, %v465_v24  ;;  %v219_v56 = vand.u32 2147483647, %v1060_v37 }
  0x60   :  { %v469_v45 = vshrl.u32 %v812_v36, %v466_v28  ;;  %v472_v51 = vshrl.u32 %v813_v38, %v466_v28  ;;  %v475_v54 = vshrl.u32 %v814_v40, %v466_v28  ;;  %v311_v43 = vclz %v1063_v13 }
  0x61   :  { %v413_v48 = vsub.s32 0, %v1065_v39  ;;  %v559_v58 = vshrl.u32 %v558_v17, 23  ;;  %v478_v32 = vshrl.u32 %v815_v42, %v466_v28  ;;  %v480_v14 = vshll.u32 %v815_v42, %v465_v24 }
  0x62   :  { %v470_v60 = vor.u32 %v469_v45, %v468_v29  ;;  %v473_v1 = vor.u32 %v472_v51, %v471_v46  ;;  %v403_v15 = vadd.s32 %v1009_v33, %v1020_v47  ;;  %v467_v62 = vshrl.u32 %v811_v34, %v466_v28 }
  0x63   :  { %v695_v57 = vmin.u32 %v413_v48, %v1065_v39  ;;  %v499_v16 = vshll.u32 %v459_v49, 8  ;;  %v476_v20 = vor.u32 %v475_v54, %v474_v53  ;;  %v479_v22 = vor.u32 %v478_v32, %v477_v55 }
  0x64   :  { %v481_v23 = vshrl.u32 %v816_v50, %v466_v28  ;;  %vm483_vm13 = vcmp.lt.s32.totalorder %v464_v52, 1  ;;  %vm485_vm14 = vcmp.lt.s32.totalorder %v464_v52, 3  ;;  %vm486_vm15 = vcmp.lt.s32.totalorder %v464_v52, 4 }
  0x65   :  { %v415_v59 = vclz %v695_v57  ;;  %v702_v27 = vadd.s32 4294967169, %v559_v58  ;;  %vm484_vm0 = vcmp.lt.s32.totalorder %v464_v52, 2  ;;  %v488_v37 = vsel %vm486_vm15, %v476_v20, 2102212464 }
  0x66   :  { %v482_v6 = vor.u32 %v481_v23, %v480_v14  ;;  %v491_v24 = vsel %vm483_vm13, %v470_v60, %v473_v1  ;;  %v487_v13 = vsel %vm483_vm13, %v467_v62, %v470_v60  ;;  %v489_v33 = vsel %vm485_vm14, %v473_v1, %v488_v37 }
  0x67   :  { %v696_v0 = vadd.s32 4294967294, %v415_v59  ;;  %v492_v47 = vsel %vm486_vm15, %v479_v22, 920167782  ;;  %v495_v45 = vsel %vm483_vm13, %v473_v1, %v476_v20  ;;  %v490_v53 = vsel %vm484_vm0, %v487_v13, %v489_v33 }
  0x68   :  { %v493_v29 = vsel %vm485_vm14, %v476_v20, %v492_v47  ;;  %v496_v46 = vsel %vm486_vm15, %v482_v6, 1326507024  ;;  %v565_v1 = vadd.s32 1, %v702_v27  ;;  %742 = vsinq.f32 %v123_v63 }
  0x69   :  { %vm697_vm1 = vcmp.lt.s32.totalorder %v696_v0, 0  ;;  %v494_v51 = vsel %vm484_vm0, %v491_v24, %v493_v29  ;;  %v497_v54 = vsel %vm485_vm14, %v479_v22, %v496_v46  ;;  %v555_v62 = vand.u32 2147483647, %v1034_v31 }
  0x6a   :  { %v418_v17 = vsel %vm697_vm1, 0, %v696_v0  ;;  %v1092_v55 = vmul.u32.u64.low %v499_v16, %v494_v51  ;;  %v1093_v57 = vmul.u32.u64.high %v499_v16, %v494_v51, %v1092_v55  ;;  %v498_v32 = vsel %vm484_vm0, %v495_v45, %v497_v54  ;;  %v1097_v14 = vpop.eup %740 }
  0x6b   :  { %v419_v28 = vsub.s32 32, %v418_v17  ;;  %v420_v48 = vshll.u32 %v1065_v39, %v418_v17  ;;  %v423_v49 = vsub.s32 4294967266, %v418_v17  ;;  %v128_v20 = vadd.s32 3, %v124_v35 }
  0x6c   :  { %v1099_v39 = vmul.u32.u64.low %v499_v16, %v498_v32  ;;  %v1100_v59 = vmul.u32.u64.high %v499_v16, %v498_v32, %v1099_v39  ;;  %vm1109_vm2 = vcmp.le.f32.partialorder %v347_v7, 0.7853982  ;;  %vm566_vm3 = vcmp.gt.s32.totalorder %v565_v1, 0 }
  0x6d   :  { %v421_v58 = vshrl.u32 %v403_v15, %v419_v28  ;;  %v424_v60 = vadd.s32 127, %v423_v49  ;;  %v1115_v63 = vmul.f32 %v221_v18, %v219_v56  ;;  %v506_v23 = vmul.u32 %v499_v16, %v490_v53 }
  0x6e   :  { %v509_v0 = vadd.s32 1, %v1093_v57  ;;  %v567_v19 = vsel %vm566_vm3, %v565_v1, 0  ;;  %v692_v27 = vadd.s32 4294967294, %v311_v43  ;;  %vm349_vm4 = vcmp.lt.s32.totalorder %v849_v25, 0 }
  0x6f   :  { %v422_v52 = vor.u32 %v421_v58, %v420_v48  ;;  %v425_v22 = vshll.u32 %v424_v60, 23  ;;  %v569_v6 = vand.u32 31, %v567_v19  ;;  %v433_v7 = vsub.s32 4, %v1047_v21 }
  0x70   :  { %vm508_vm5 = vc.u32 %v1100_v59, %v1092_v55  ;;  %v562_v26 = vand.u32 8388607, %v555_v62  ;;  %v1124_v18 = vand.u32 3, %v128_v20  ;;  %v135_v43 = vxor.u32 2147483648, %v1097_v14 }
  0x71   :  { %v426_v61 = vor.u32 4788187, %v425_v22  ;;  %v429_v35 = vcvt.s32.f32 %v422_v52  ;;  %v510_v16 = vsel %vm508_vm5, %v509_v0, %v1093_v57  ;;  %v570_v37 = vsub.s32 32, %v569_v6 }
  0x72   :  { %v223_v24 = vxor.u32 2147483648, %v1115_v63  ;;  %v511_v13 = vadd.s32 %v510_v16, %v506_v23  ;;  %v572_v33 = vshll.u32 %v811_v34, %v569_v6  ;;  %vm693_vm6 = vcmp.lt.s32.totalorder %v692_v27, 0 }
  0x73   :  { %v427_v56 = vand.u32 2147483647, %v426_v61  ;;  %v573_v17 = vshrl.u32 %v812_v36, %v570_v37  ;;  %v575_v29 = vshll.u32 %v812_v36, %v569_v6  ;;  %v434_v45 = vsel %vm349_vm4, %v433_v7, %v1047_v21 }
  0x74   :  { %v512_v46 = vadd.s32 536870912, %v511_v13  ;;  %v563_v28 = vor.u32 8388608, %v562_v26  ;;  %v576_v48 = vshrl.u32 %v813_v38, %v570_v37  ;;  %vm134_vm7 = vcmp.eq.s32.totalorder %v1124_v18, 2 }
  0x75   :  { %v430_v47 = vmul.f32 %v429_v35, %v427_v56  ;;  %vm141_vm8 = vcmp.lt.s32.totalorder %v836_v4, 0  ;;  %v568_v51 = vshrl.u32 %v567_v19, 5  ;;  %v578_v53 = vshll.u32 %v813_v38, %v569_v6  ;;  %v743_v23 = vpop.eup %742 }
  0x76   :  { %v579_v54 = vshrl.u32 %v814_v40, %v570_v37  ;;  %vm131_vm9 = vcmp.eq.s32.totalorder %v1124_v18, 0  ;;  %v1141_v36 = vshrl.u32 %v512_v46, 30  ;;  %v574_v57 = vor.u32 %v573_v17, %v572_v33 }
  0x77   :  { %v431_v49 = vxor.u32 2147483648, %v430_v47  ;;  %v581_v21 = vshll.u32 %v814_v40, %v569_v6  ;;  %v582_v58 = vshrl.u32 %v815_v42, %v570_v37  ;;  %v577_v32 = vor.u32 %v576_v48, %v575_v29 }
  0x78   :  { %v584_v1 = vshll.u32 %v815_v42, %v569_v6  ;;  %v585_v39 = vshrl.u32 %v816_v50, %v570_v37  ;;  %vm1151_vm10 = vcmp.le.f32.partialorder %v139_v8, 0.7853982  ;;  %v436_v20 = vsel %vm1109_vm2, 0, %v434_v45 }
  0x79   :  { %v432_v60 = vsel %vm349_vm4, %v431_v49, %v430_v47  ;;  %v514_v52 = vshll.u32 %v1141_v36, 30  ;;  %v583_v22 = vor.u32 %v582_v58, %v581_v21  ;;  %v580_v42 = vor.u32 %v579_v54, %v578_v53 }
  0x7a   :  { %v435_v40 = vsel %vm1109_vm2, %v849_v25, %v432_v60  ;;  %v586_v50 = vor.u32 %v585_v39, %v584_v1  ;;  %vm587_vm11 = vcmp.lt.s32.totalorder %v568_v51, 1  ;;  %v571_v0 = vshrl.u32 %v811_v34, %v570_v37 }
  0x7b   :  { %744 = vcosq.f32 %v435_v40  ;;  %v1161_v8 = vsub.s32 %v511_v13, %v514_v52  ;;  %vm589_vm12 = vcmp.lt.s32.totalorder %v568_v51, 3  ;;  %vm588_vm13 = vcmp.lt.s32.totalorder %v568_v51, 2 }
  0x7c   :  { %746 = vsinq.f32 %v435_v40  ;;  %vm590_vm14 = vcmp.lt.s32.totalorder %v568_v51, 4  ;;  %v595_v19 = vsel %vm587_vm11, %v574_v57, %v577_v32  ;;  %v603_v15 = vshll.u32 %v563_v28, 8 }
  0x7d   :  { %v132_v61 = vxor.u32 2147483648, %v743_v23  ;;  %v517_v35 = vsub.s32 0, %v1161_v8  ;;  %v592_v6 = vsel %vm590_vm14, %v580_v42, 2102212464  ;;  %v596_v7 = vsel %vm590_vm14, %v583_v22, 920167782 }
  0x7e   :  { %v1167_v26 = vsel %vm693_vm6, 0, %v692_v27  ;;  %v440_v56 = vadd.s32 3, %v436_v20  ;;  %v597_v16 = vsel %vm589_vm12, %v580_v42, %v596_v7  ;;  %v600_v13 = vsel %vm590_vm14, %v586_v50, 1326507024 }
  0x7f   :  { %v699_v34 = vmin.u32 %v517_v35, %v1161_v8  ;;  %v591_v37 = vsel %vm587_vm11, %v571_v0, %v574_v57  ;;  %v598_v33 = vsel %vm588_vm13, %v595_v19, %v597_v16  ;;  %v599_v47 = vsel %vm587_vm11, %v577_v32, %v580_v42 }
  0x80   :  { %vm127_vm15 = vweird.f32 %v834_v3  ;;  %v593_v17 = vsel %vm589_vm12, %v577_v32, %v592_v6  ;;  %v601_v29 = vsel %vm589_vm12, %v583_v22, %v600_v13  ;;  %vm130_vm0 = vcmp.lt.s32.totalorder %v1124_v18, 2 }
  0x81   :  { %v1177_v27 = vmul.u32.u64.low %v603_v15, %v598_v33  ;;  %v1178_v45 = vmul.u32.u64.high %v603_v15, %v598_v33, %v1177_v27  ;;  %v136_v46 = vsel %vm134_vm7, %v135_v43, %v743_v23  ;;  %v224_v28 = vsel %vm141_vm8, %v223_v24, %v1115_v63 }
  0x82   :  { %v519_v48 = vclz %v699_v34  ;;  %v133_v49 = vsel %vm131_vm9, %v1097_v14, %v132_v61  ;;  %v319_v53 = vsub.s32 4294967266, %v1167_v26  ;;  %v441_v54 = vand.u32 3, %v440_v56 }
  0x83   :  { %v602_v57 = vsel %vm588_vm13, %v599_v47, %v601_v29  ;;  %v594_v58 = vsel %vm588_vm13, %v591_v37, %v593_v17  ;;  %v227_v63 = vsel %vm1151_vm10, %v836_v4, %v224_v28  ;;  %v299_v24 = vadd.s32 %v968_v10, %v966_v44 }
  0x84   :  { %v700_v21 = vadd.s32 4294967294, %v519_v48  ;;  %v1197_v43 = vmul.u32.u64.low %v603_v15, %v602_v57  ;;  %v1198_v60 = vmul.u32.u64.high %v603_v15, %v602_v57, %v1197_v43  ;;  %v315_v14 = vsub.s32 32, %v1167_v26 }
  0x85   :  { %vm439_vm1 = vweird.f32 %v849_v25  ;;  %v316_v32 = vshll.u32 %v1030_v2, %v1167_v26  ;;  %v507_v51 = vadd.s32 %v1092_v55, %v1100_v59  ;;  %v613_v1 = vadd.s32 1, %v1178_v45 }
  0x86   :  { %vm701_vm2 = vcmp.lt.s32.totalorder %v700_v21, 0  ;;  %v137_v39 = vsel %vm130_vm0, %v133_v49, %v136_v46  ;;  %v320_v40 = vadd.s32 127, %v319_v53  ;;  %v610_v52 = vmul.u32 %v603_v15, %v594_v58 }
  0x87   :  { %v522_v20 = vsel %vm701_vm2, 0, %v700_v21  ;;  %vm446_vm3 = vcmp.eq.s32.totalorder %v441_v54, 2  ;;  %vm442_vm4 = vcmp.lt.s32.totalorder %v441_v54, 2  ;;  %vm443_vm5 = vcmp.eq.s32.totalorder %v441_v54, 0 }
  0x88   :  { %v745_v44 = vpop.eup %744  ;;  %v523_v10 = vsub.s32 32, %v522_v20  ;;  %v524_v22 = vshll.u32 %v1161_v8, %v522_v20  ;;  %v527_v23 = vsub.s32 4294967266, %v522_v20  ;;  %vm612_vm6 = vc.u32 %v1198_v60, %v1177_v27 }
  0x89   :  { %v747_v42 = vpop.eup %746  ;;  %v447_v2 = vxor.u32 2147483648, %v745_v44  ;;  %v614_v50 = vsel %vm612_vm6, %v613_v1, %v1178_v45  ;;  %v317_v0 = vshrl.u32 %v299_v24, %v315_v14  ;;  %v321_v19 = vshll.u32 %v320_v40, 23 }
  0x8a   :  { %v444_v55 = vxor.u32 2147483648, %v747_v42  ;;  %v525_v59 = vshrl.u32 %v507_v51, %v523_v10  ;;  %v528_v18 = vadd.s32 127, %v527_v23  ;;  %v615_v61 = vadd.s32 %v614_v50, %v610_v52 }
  0x8b   :  { %v448_v15 = vsel %vm446_vm3, %v447_v2, %v747_v42  ;;  %v138_v8 = vsel %vm127_vm15, nan, %v137_v39  ;;  %v225_v26 = vsub.s32 4, %v950_v41  ;;  %748 = vcosq.f32 %v227_v63 }
  0x8c   :  { %v445_v35 = vsel %vm443_vm5, %v745_v44, %v444_v55  ;;  %v526_v6 = vor.u32 %v525_v59, %v524_v22  ;;  %v529_v7 = vshll.u32 %v528_v18, 23  ;;  %v616_v16 = vadd.s32 536870912, %v615_v61 }
  0x8d   :  { %v449_v56 = vsel %vm442_vm4, %v445_v35, %v448_v15  ;;  %750 = vsinq.f32 %v227_v63  ;;  %v318_v33 = vor.u32 %v317_v0, %v316_v32  ;;  %v322_v47 = vor.u32 4788187, %v321_v19 }
  0x8e   :  { %v450_v13 = vsel %vm439_vm1, nan, %v449_v56  ;;  %v530_v34 = vor.u32 4788187, %v529_v7  ;;  %v533_v37 = vcvt.s32.f32 %v526_v6  ;;  %v1224_v17 = vshrl.u32 %v616_v16, 30 }
  0x8f   :  { %v659_v3 = vmul.f32 %v450_v13, %v138_v8  ;;  %v226_v46 = vsel %vm141_vm8, %v225_v26, %v950_v41  ;;  %vm453_vm7 = vcmp.lt.s32.totalorder %v1001_v12, 0  ;;  %v323_v25 = vand.u32 2147483647, %v322_v47 }
  0x90   :  { %v531_v29 = vand.u32 2147483647, %v530_v34  ;;  %v618_v45 = vshll.u32 %v1224_v17, 30  ;;  %v325_v48 = vcvt.s32.f32 %v318_v33  ;;  %v537_v49 = vsub.s32 4, %v1141_v36 }
  0x91   :  { %662 = vst [vmem:[#allocation5] sm:$0xff] %v659_v3  ;;  %vm1234_vm9 = vcmp.le.f32.partialorder %v451_v9, 0.7853982  ;;  %v228_v21 = vsel %vm1151_vm10, 0, %v226_v46  ;;  %vm245_vm8 = vcmp.lt.s32.totalorder %v838_v5, 0  ;;  %v611_v52 = vadd.s32 %v1177_v27, %v1198_v60 }
  0x92   :  { %v534_v28 = vmul.f32 %v533_v37, %v531_v29  ;;  %v619_v53 = vsub.s32 %v615_v61, %v618_v45  ;;  %v326_v43 = vmul.f32 %v325_v48, %v323_v25  ;;  %v538_v63 = vsel %vm453_vm7, %v537_v49, %v1141_v36 }
  0x93   :  { %v232_v32 = vadd.s32 3, %v228_v21  ;;  %v540_v1 = vsel %vm1234_vm9, 0, %v538_v63  ;;  %vm1251_vm11 = vcmp.le.f32.partialorder %v243_v11, 0.7853982  ;;  %vm231_vm15 = vweird.f32 %v836_v4 }
  0x94   :  { %v535_v57 = vxor.u32 2147483648, %v534_v28  ;;  %v621_v58 = vsub.s32 0, %v619_v53  ;;  %v327_v39 = vxor.u32 2147483648, %v326_v43  ;;  %v544_v36 = vadd.s32 3, %v540_v1 }
  0x95   :  { %v233_v20 = vand.u32 3, %v232_v32  ;;  %v329_v61 = vsub.s32 4, %v1013_v30  ;;  %vm543_vm3 = vweird.f32 %v1001_v12  ;;  %vm557_vm4 = vcmp.lt.s32.totalorder %v1034_v31, 0 }
  0x96   :  { %v536_v41 = vsel %vm453_vm7, %v535_v57, %v534_v28  ;;  %v703_v14 = vmin.u32 %v621_v58, %v619_v53  ;;  %v328_v42 = vsel %vm245_vm8, %v327_v39, %v326_v43  ;;  %v545_v18 = vand.u32 3, %v544_v36 }
  0x97   :  { %v539_v24 = vsel %vm1234_vm9, %v1001_v12, %v536_v41  ;;  %vm235_vm12 = vcmp.eq.s32.totalorder %v233_v20, 0  ;;  %vm238_vm13 = vcmp.eq.s32.totalorder %v233_v20, 2  ;;  %vm234_vm14 = vcmp.lt.s32.totalorder %v233_v20, 2 }
  0x98   :  { %752 = vcosq.f32 %v539_v24  ;;  %v623_v9 = vclz %v703_v14  ;;  %v749_v51 = vpop.eup %748  ;;  %v331_v11 = vsel %vm1251_vm11, %v838_v5, %v328_v42  ;;  %vm550_vm0 = vcmp.eq.s32.totalorder %v545_v18, 2 }
  0x99   :  { %754 = vsinq.f32 %v539_v24  ;;  %v239_v10 = vxor.u32 2147483648, %v749_v51  ;;  %vm547_vm1 = vcmp.eq.s32.totalorder %v545_v18, 0  ;;  %vm546_vm2 = vcmp.lt.s32.totalorder %v545_v18, 2 }
  0x9a   :  { %v751_v38 = vpop.eup %750  ;;  %v704_v40 = vadd.s32 4294967294, %v623_v9  ;;  %756 = vcosq.f32 %v331_v11  ;;  %v330_v33 = vsel %vm245_vm8, %v329_v61, %v1013_v30  ;;  %v641_v45 = vsub.s32 4, %v1224_v17 }
  0x9b   :  { %v236_v44 = vxor.u32 2147483648, %v751_v38  ;;  %v240_v0 = vsel %vm238_vm13, %v239_v10, %v751_v38  ;;  %758 = vsinq.f32 %v331_v11  ;;  %vm556_vm5 = vcmp.le.f32.partialorder %v555_v62, 0.7853982 }
  0x9c   :  { %vm705_vm10 = vcmp.lt.s32.totalorder %v704_v40, 0  ;;  %v332_v4 = vsel %vm1251_vm11, 0, %v330_v33  ;;  %v642_v48 = vsel %vm557_vm4, %v641_v45, %v1224_v17  ;;  %vm647_vm13 = vweird.f32 %v1034_v31 }
  0x9d   :  { %v626_v23 = vsel %vm705_vm10, 0, %v704_v40  ;;  %v237_v50 = vsel %vm235_vm12, %v749_v51, %v236_v44  ;;  %v336_v49 = vadd.s32 3, %v332_v4  ;;  %vm335_vm10 = vweird.f32 %v838_v5 }
  0x9e   :  { %v627_v2 = vsub.s32 32, %v626_v23  ;;  %v628_v55 = vshll.u32 %v619_v53, %v626_v23  ;;  %v631_v59 = vsub.s32 4294967266, %v626_v23  ;;  %v241_v26 = vsel %vm234_vm14, %v237_v50, %v240_v0 }
  0x9f   :  { %v242_v37 = vsel %vm231_vm15, nan, %v241_v26  ;;  %v644_v53 = vsel %vm556_vm5, 0, %v642_v48  ;;  %v337_v21 = vand.u32 3, %v336_v49 }
  0xa0   :  { %v629_v27 = vshrl.u32 %v611_v52, %v627_v2  ;;  %v632_v60 = vadd.s32 127, %v631_v59  ;;  %v648_v58 = vadd.s32 3, %v644_v53 }
  0xa1   :  { %vm339_vm6 = vcmp.eq.s32.totalorder %v337_v21, 0  ;;  %vm342_vm7 = vcmp.eq.s32.totalorder %v337_v21, 2  ;;  %vm338_vm9 = vcmp.lt.s32.totalorder %v337_v21, 2 }
  0xa2   :  { %v630_v19 = vor.u32 %v629_v27, %v628_v55  ;;  %v633_v15 = vshll.u32 %v632_v60, 23  ;;  %v649_v43 = vand.u32 3, %v648_v58 }
  0xa4   :  { %v634_v35 = vor.u32 4788187, %v633_v15  ;;  %v637_v6 = vcvt.s32.f32 %v630_v19  ;;  %vm654_vm8 = vcmp.eq.s32.totalorder %v649_v43, 2  ;;  %vm651_vm11 = vcmp.eq.s32.totalorder %v649_v43, 0 }
  0xa5   :  { %v753_v8 = vpop.eup %752  ;;  %vm650_vm12 = vcmp.lt.s32.totalorder %v649_v43, 2 }
  0xa6   :  { %v755_v7 = vpop.eup %754  ;;  %v551_v56 = vxor.u32 2147483648, %v753_v8  ;;  %v635_v13 = vand.u32 2147483647, %v634_v35 }
  0xa7   :  { %v548_v16 = vxor.u32 2147483648, %v755_v7  ;;  %v757_v54 = vpop.eup %756 }
  0xa8   :  { %v552_v34 = vsel %vm550_vm0, %v551_v56, %v755_v7  ;;  %v638_v3 = vmul.f32 %v637_v6, %v635_v13  ;;  %v759_v57 = vpop.eup %758  ;;  %v343_v41 = vxor.u32 2147483648, %v757_v54 }
  0xa9   :  { %v549_v47 = vsel %vm547_vm1, %v753_v8, %v548_v16  ;;  %v340_v62 = vxor.u32 2147483648, %v759_v57 }
  0xaa   :  { %v553_v29 = vsel %vm546_vm2, %v549_v47, %v552_v34  ;;  %v639_v12 = vxor.u32 2147483648, %v638_v3  ;;  %v344_v24 = vsel %vm342_vm7, %v343_v41, %v759_v57 }
  0xab   :  { %v554_v46 = vsel %vm543_vm3, nan, %v553_v29  ;;  %v341_v63 = vsel %vm339_vm6, %v757_v54, %v340_v62 }
  0xac   :  { %v660_v28 = vmul.f32 %v554_v46, %v242_v37  ;;  %v640_v25 = vsel %vm557_vm4, %v639_v12, %v638_v3  ;;  %v345_v32 = vsel %vm338_vm9, %v341_v63, %v344_v24 }
  0xad   :  { %v643_v30 = vsel %vm556_vm5, %v1034_v31, %v640_v25  ;;  %v346_v38 = vsel %vm335_vm10, nan, %v345_v32 }
  0xae   :  { %663 = vst [vmem:[#allocation5 + $0x8] sm:$0xff] %v660_v28  ;;  %760 = vcosq.f32 %v643_v30 }
  0xaf   :  { %762 = vsinq.f32 %v643_v30 }
  0xbb   :  { %v761_v17 = vpop.eup %760 }
  0xbc   :  { %v763_v14 = vpop.eup %762  ;;  %v655_v9 = vxor.u32 2147483648, %v761_v17 }
  0xbd   :  { %v652_v51 = vxor.u32 2147483648, %v763_v14 }
  0xbe   :  { %v656_v1 = vsel %vm654_vm8, %v655_v9, %v763_v14 }
  0xbf   :  { %v653_v39 = vsel %vm651_vm11, %v761_v17, %v652_v51 }
  0xc0   :  { %v657_v40 = vsel %vm650_vm12, %v653_v39, %v656_v1 }
  0xc1   :  { %v658_v20 = vsel %vm647_vm13, nan, %v657_v40 }
  0xc2   :  { %v661_v36 = vmul.f32 %v658_v20, %v346_v38 }
  0xc4   :  { %664 = vst [vmem:[#allocation5 + $0x10] sm:$0xff] %v661_v36 }
  0xc5   :  { %795 = shalt.err (!%p792_p9)
}
  0xc6   :  { %676 = dma.vmem_to_hbm [thread:$0]  %s671_s13, 384, %s1285_s1, [#allocation4], %s809_s9, %s809_s9, %s810_s10  }
  0xc7   :  { %806 = dma.done.wait [#allocation4], 384  }
  0xc8   :  { %807 = vsyncadd [#allocation4], 4294966912 }
  0xc9   :  { %680 = vsyncpa [#allocation3], 1 }
  0xca   :  { %681 = vsyncpa [#allocation4], 1 }

</bundles_post_ra>
